<compile_context>
chip_gen: v5e
topology: v5e:2x2
jax: 0.10.0
libtpu: 0.0.40
codegen_flags: <defaults>
</compile_context>

<pallas_src>
import math

import jax
import jax.numpy as jnp
from jax.experimental import pallas as pl
from jax.experimental.pallas import tpu as pltpu


def siamese_kernel(xs_ref, wf_ref, bf_ref, wo_ref, bo_ref, out_ref, acc_ref):
    """Grid = (M tiles, K tiles).  K is the reduction axis (last, "arbitrary").

    xs_ref  : (2*TB, TK) bf16   interleaved [x1 tile rows ; x2 tile rows]
    wf_ref  : (TK, 128)  bf16   shared feature-extractor weight K-slice
    bf_ref  : (1, 128)   f32    feature-extractor bias
    wo_ref  : (128, 128) bf16   fc_out weight, zero-padded 64 -> 128 cols
    bo_ref  : (1, 128)   f32    fc_out bias, zero-padded
    out_ref : (TB, 128)  f32    lane-dense output tile (cols 64..127 are pad)
    acc_ref : (2*TB, 128) f32   VMEM accumulator, persistent across K steps
    """
    k = pl.program_id(1)

    @pl.when(k == 0)
    def _():
        acc_ref[...] = jnp.zeros_like(acc_ref)

    # Single fused two-tower matmul: (2*TB, TK) @ (TK, 128), f32 accumulate.
    acc_ref[...] += jnp.dot(xs_ref[...], wf_ref[...],
                            preferred_element_type=jnp.float32)

    @pl.when(k == pl.num_programs(1) - 1)
    def _():
        # f32 epilogue (bias + ReLU) — shared feature extractor output.
        feat = jnp.maximum(acc_ref[...] + bf_ref[...], 0.0)
        tb = out_ref.shape[0]
        diff = jnp.abs(feat[:tb, :] - feat[tb:, :])          # |feat1 - feat2|
        out = jnp.dot(diff.astype(wo_ref.dtype), wo_ref[...],
                      preferred_element_type=jnp.float32) + bo_ref[...]
        out_ref[...] = out.astype(out_ref.dtype)             # full 128-lane store


def _round_up(x, m):
    return (x + m - 1) // m * m


def siamese_forward(x1, x2, w_feat, b_feat, w_out, b_out, *,
                    tile_b=128, tile_k=256):
    """x1, x2: (B, C, H, W) float32.  Returns (B, 64) float32."""
    B = x1.shape[0]
    D = math.prod(x1.shape[1:])
    F = w_feat.shape[1]            # 128 (fixed by fc_out's input dim)
    N = w_out.shape[1]             # 64
    assert w_out.shape[0] == F and F == 128

    N_PAD = 128                    # lane-dense second GEMM / output store
    tb = max(8, _round_up(min(tile_b, B), 8))
    B_pad = _round_up(B, tb)
    num_m = B_pad // tb
    tk = min(tile_k, _round_up(D, 128))
    D_pad = _round_up(D, tk)
    num_k = D_pad // tk

    def pad2(a, rows, cols):
        return jnp.pad(a, ((0, rows - a.shape[0]), (0, cols - a.shape[1])))

    # bf16 matmul operands (MXU fast path); zero-pad to tile multiples.
    x1p = pad2(x1.reshape(B, D), B_pad, D_pad).astype(jnp.bfloat16)
    x2p = pad2(x2.reshape(B, D), B_pad, D_pad).astype(jnp.bfloat16)
    # Interleave per M-tile so each grid block holds matched (x1, x2) row pairs
    # and the two towers become one (2*TB, TK) @ (TK, 128) matmul.
    xs = jnp.concatenate([x1p.reshape(num_m, tb, D_pad),
                          x2p.reshape(num_m, tb, D_pad)], axis=1)

    wfp = pad2(w_feat, D_pad, F).astype(jnp.bfloat16)
    bfp = b_feat.reshape(1, F).astype(jnp.float32)
    wop = pad2(w_out, F, N_PAD).astype(jnp.bfloat16)
    bop = jnp.pad(b_out, (0, N_PAD - N)).reshape(1, N_PAD).astype(jnp.float32)

    flops = 2 * (2 * B_pad) * D_pad * F + 2 * B_pad * F * N_PAD
    bytes_accessed = (xs.size * 2 + wfp.size * 2 + wop.size * 2
                      + bfp.size * 4 + bop.size * 4 + B_pad * N_PAD * 4)

    out = pl.pallas_call(
        siamese_kernel,
        out_shape=jax.ShapeDtypeStruct((B_pad, N_PAD), jnp.float32),
        grid_spec=pltpu.PrefetchScalarGridSpec(
            num_scalar_prefetch=0,
            grid=(num_m, num_k),
            in_specs=[
                pl.BlockSpec((None, 2 * tb, tk), lambda i, k: (i, 0, k)),
                pl.BlockSpec((tk, F), lambda i, k: (k, 0)),
                pl.BlockSpec((1, F), lambda i, k: (0, 0)),
                pl.BlockSpec((F, N_PAD), lambda i, k: (0, 0)),
                pl.BlockSpec((1, N_PAD), lambda i, k: (0, 0)),
            ],
            out_specs=pl.BlockSpec((tb, N_PAD), lambda i, k: (i, 0)),
            scratch_shapes=[pltpu.VMEM((2 * tb, F), jnp.float32)],
        ),
        compiler_params=pltpu.CompilerParams(
            dimension_semantics=("parallel", "arbitrary")),
        cost_estimate=pl.CostEstimate(
            flops=flops, transcendentals=0, bytes_accessed=bytes_accessed),
    )(xs, wfp, bfp, wop, bop)

    return out[:B, :N]


def _torch_linear_init(key, fan_in, fan_out):
    """Deterministic init mimicking nn.Linear default (uniform +-1/sqrt(fan_in))."""
    kw, kb = jax.random.split(key)
    bound = 1.0 / jnp.sqrt(jnp.float32(fan_in))
    w = jax.random.uniform(kw, (fan_in, fan_out), jnp.float32, -bound, bound)
    b = jax.random.uniform(kb, (fan_out,), jnp.float32, -bound, bound)
    return w, b


if __name__ == "__main__":
    key = jax.random.PRNGKey(0)
    k_x1, k_x2, k_feat, k_out = jax.random.split(key, 4)

    # Small NCHW inputs consistent with an image-pair Siamese setup.
    B, C, H, W = 2, 4, 16, 16
    D = C * H * W
    x1 = jax.random.normal(k_x1, (B, C, H, W), jnp.float32)
    x2 = jax.random.normal(k_x2, (B, C, H, W), jnp.float32)

    # feature_extractor: Linear(D, 128) + ReLU (shared weights across towers)
    w_feat, b_feat = _torch_linear_init(k_feat, D, 128)
    # fc_out: Linear(128, 64)
    w_out, b_out = _torch_linear_init(k_out, 128, 64)

    out = jax.block_until_ready(
        siamese_forward(x1, x2, w_feat, b_feat, w_out, b_out))

    # Reference with identical arithmetic (bf16 operands, f32 accumulation).
    def ref_bf16(a, b):
        ab = a.reshape(B, D).astype(jnp.bfloat16)
        bb = b.reshape(B, D).astype(jnp.bfloat16)
        wfb = w_feat.astype(jnp.bfloat16)
        wob = w_out.astype(jnp.bfloat16)
        f1 = jnp.maximum(jnp.dot(ab, wfb, preferred_element_type=jnp.float32) + b_feat, 0.0)
        f2 = jnp.maximum(jnp.dot(bb, wfb, preferred_element_type=jnp.float32) + b_feat, 0.0)
        d = jnp.abs(f1 - f2)
        return jnp.dot(d.astype(jnp.bfloat16), wob,
                       preferred_element_type=jnp.float32) + b_out

    # Full-f32 reference (PyTorch-module semantics).
    def ref_f32(a, b):
        f1 = jnp.maximum(a.reshape(B, D) @ w_feat + b_feat, 0.0)
        f2 = jnp.maximum(b.reshape(B, D) @ w_feat + b_feat, 0.0)
        return jnp.abs(f1 - f2) @ w_out + b_out

    assert out.shape == (B, 64)
    assert bool(jnp.all(jnp.isfinite(out)))
    assert jnp.allclose(out, ref_bf16(x1, x2), atol=2e-2, rtol=2e-2)
    assert jnp.allclose(out, ref_f32(x1, x2), atol=1e-1, rtol=1e-1)

    print("KERNEL_OK")
</pallas_src>

<mosaic_0001>
module attributes {stable_mosaic.version = 11 : i64} {
  func.func @siamese_kernel(%arg0: i32, %arg1: i32, %arg2: memref<1x16x256xbf16, #tpu.memory_space<vmem>>, %arg3: memref<256x128xbf16, #tpu.memory_space<vmem>>, %arg4: memref<1x128xf32, #tpu.memory_space<vmem>>, %arg5: memref<128x128xbf16, #tpu.memory_space<vmem>>, %arg6: memref<1x128xf32, #tpu.memory_space<vmem>>, %arg7: memref<8x128xf32, #tpu.memory_space<vmem>>, %arg8: memref<16x128xf32, #tpu.memory_space<vmem>>) attributes {dimension_semantics = [#tpu.dimension_semantics<parallel>, #tpu.dimension_semantics<arbitrary>], iteration_bounds = array<i64: 1, 4>, scalar_prefetch = 0 : i64, scratch_operands = 1 : i64, tpu.core_type = #tpu.core_type<tc>, window_params = [{transform_indices = @transform_0, window_bounds = array<i64: 1, 16, 256>}, {transform_indices = @transform_1, window_bounds = array<i64: 256, 128>}, {pipeline_mode = #tpu.pipeline_mode<synchronous>, transform_indices = @transform_2, window_bounds = array<i64: 1, 128>}, {pipeline_mode = #tpu.pipeline_mode<synchronous>, transform_indices = @transform_3, window_bounds = array<i64: 128, 128>}, {pipeline_mode = #tpu.pipeline_mode<synchronous>, transform_indices = @transform_4, window_bounds = array<i64: 1, 128>}, {transform_indices = @transform_5, window_bounds = array<i64: 8, 128>}]} {
    %c0_i32 = arith.constant 0 : i32
    %0 = arith.cmpi eq, %arg1, %c0_i32 : i32
    %1 = arith.extui %0 : i1 to i32
    %c0_i32_0 = arith.constant 0 : i32
    %2 = arith.cmpi ne, %1, %c0_i32_0 : i32
    scf.if %2 {
      %cst_10 = arith.constant 0.000000e+00 : f32
      %13 = vector.broadcast %cst_10 : f32 to vector<16x128xf32>
      %c0_11 = arith.constant 0 : index
      %c0_12 = arith.constant 0 : index
      %14 = vector.load %arg8[%c0_11, %c0_12] : memref<16x128xf32, #tpu.memory_space<vmem>>, vector<16x128xf32>
      tpu.vector_store %arg8[%c0_11, %c0_12], %13 {strides = array<i32>} : memref<16x128xf32, #tpu.memory_space<vmem>>, vector<16x128xf32>,
    } else {
    }
    %c0 = arith.constant 0 : index
    %c0_1 = arith.constant 0 : index
    %3 = vector.load %arg8[%c0, %c0_1] : memref<16x128xf32, #tpu.memory_space<vmem>>, vector<16x128xf32>
    %c0_2 = arith.constant 0 : index
    %c0_3 = arith.constant 0 : index
    %c0_4 = arith.constant 0 : index
    %4 = vector.load %arg2[%c0_2, %c0_3, %c0_4] : memref<1x16x256xbf16, #tpu.memory_space<vmem>>, vector<1x16x256xbf16>
    %5 = vector.shape_cast %4 : vector<1x16x256xbf16> to vector<16x256xbf16>
    %c0_5 = arith.constant 0 : index
    %c0_6 = arith.constant 0 : index
    %6 = vector.load %arg3[%c0_5, %c0_6] : memref<256x128xbf16, #tpu.memory_space<vmem>>, vector<256x128xbf16>
    %cst = arith.constant dense<0.000000e+00> : vector<16x128xf32>
    %7 = tpu.matmul %5, %6, %cst {dimension_numbers = #tpu.dot_dimension_numbers<[1], [0], [0], [1], [0, 0, 1, 1], [], []>} : vector<16x256xbf16>, vector<256x128xbf16>, vector<16x128xf32> -> vector<16x128xf32>
    %8 = arith.addf %3, %7 : vector<16x128xf32>
    %c0_7 = arith.constant 0 : index
    %c0_8 = arith.constant 0 : index
    %9 = vector.load %arg8[%c0_7, %c0_8] : memref<16x128xf32, #tpu.memory_space<vmem>>, vector<16x128xf32>
    tpu.vector_store %arg8[%c0_7, %c0_8], %8 {strides = array<i32>} : memref<16x128xf32, #tpu.memory_space<vmem>>, vector<16x128xf32>,
    %c3_i32 = arith.constant 3 : i32
    %10 = arith.cmpi eq, %arg1, %c3_i32 : i32
    %11 = arith.extui %10 : i1 to i32
    %c0_i32_9 = arith.constant 0 : i32
    %12 = arith.cmpi ne, %11, %c0_i32_9 : i32
    scf.if %12 {
      %c0_10 = arith.constant 0 : index
      %c0_11 = arith.constant 0 : index
      %13 = vector.load %arg8[%c0_10, %c0_11] : memref<16x128xf32, #tpu.memory_space<vmem>>, vector<16x128xf32>
      %c0_12 = arith.constant 0 : index
      %c0_13 = arith.constant 0 : index
      %14 = vector.load %arg4[%c0_12, %c0_13] : memref<1x128xf32, #tpu.memory_space<vmem>>, vector<1x128xf32>
      %15 = vector.broadcast %14 : vector<1x128xf32> to vector<16x128xf32>
      %16 = arith.addf %13, %15 : vector<16x128xf32>
      %cst_14 = arith.constant 0.000000e+00 : f32
      %17 = vector.broadcast %cst_14 : f32 to vector<16x128xf32>
      %18 = arith.maximumf %16, %17 : vector<16x128xf32>
      %19 = vector.extract_strided_slice %18 {offsets = [0, 0], sizes = [8, 128], strides = [1, 1]} : vector<16x128xf32> to vector<8x128xf32>
      %20 = vector.extract_strided_slice %18 {offsets = [8, 0], sizes = [8, 128], strides = [1, 1]} : vector<16x128xf32> to vector<8x128xf32>
      %21 = arith.subf %19, %20 : vector<8x128xf32>
      %22 = math.absf %21 : vector<8x128xf32>
      %23 = arith.truncf %22 : vector<8x128xf32> to vector<8x128xbf16>
      %c0_15 = arith.constant 0 : index
      %c0_16 = arith.constant 0 : index
      %24 = vector.load %arg5[%c0_15, %c0_16] : memref<128x128xbf16, #tpu.memory_space<vmem>>, vector<128x128xbf16>
      %cst_17 = arith.constant dense<0.000000e+00> : vector<8x128xf32>
      %25 = tpu.matmul %23, %24, %cst_17 {dimension_numbers = #tpu.dot_dimension_numbers<[1], [0], [0], [1], [0, 0, 1, 1], [], []>} : vector<8x128xbf16>, vector<128x128xbf16>, vector<8x128xf32> -> vector<8x128xf32>
      %c0_18 = arith.constant 0 : index
      %c0_19 = arith.constant 0 : index
      %26 = vector.load %arg6[%c0_18, %c0_19] : memref<1x128xf32, #tpu.memory_space<vmem>>, vector<1x128xf32>
      %27 = vector.broadcast %26 : vector<1x128xf32> to vector<8x128xf32>
      %28 = arith.addf %25, %27 : vector<8x128xf32>
      %c0_20 = arith.constant 0 : index
      %c0_21 = arith.constant 0 : index
      %29 = vector.load %arg7[%c0_20, %c0_21] : memref<8x128xf32, #tpu.memory_space<vmem>>, vector<8x128xf32>
      tpu.vector_store %arg7[%c0_20, %c0_21], %28 {strides = array<i32>} : memref<8x128xf32, #tpu.memory_space<vmem>>, vector<8x128xf32>,
    } else {
    }
    return
  }
  func.func @transform_0(%arg0: i32, %arg1: i32) -> (i32, i32, i32) {
    %c0_i32 = arith.constant 0 : i32
    %c0_i32_0 = arith.constant 0 : i32
    return %arg0, %c0_i32, %arg1 : i32, i32, i32
  }
  func.func @transform_1(%arg0: i32, %arg1: i32) -> (i32, i32) {
    %c0_i32 = arith.constant 0 : i32
    %c0_i32_0 = arith.constant 0 : i32
    return %arg1, %c0_i32 : i32, i32
  }
  func.func @transform_2(%arg0: i32, %arg1: i32) -> (i32, i32) {
    %c0_i32 = arith.constant 0 : i32
    %c0_i32_0 = arith.constant 0 : i32
    %c0_i32_1 = arith.constant 0 : i32
    return %c0_i32, %c0_i32_0 : i32, i32
  }
  func.func @transform_3(%arg0: i32, %arg1: i32) -> (i32, i32) {
    %c0_i32 = arith.constant 0 : i32
    %c0_i32_0 = arith.constant 0 : i32
    %c0_i32_1 = arith.constant 0 : i32
    return %c0_i32, %c0_i32_0 : i32, i32
  }
  func.func @transform_4(%arg0: i32, %arg1: i32) -> (i32, i32) {
    %c0_i32 = arith.constant 0 : i32
    %c0_i32_0 = arith.constant 0 : i32
    %c0_i32_1 = arith.constant 0 : i32
    return %c0_i32, %c0_i32_0 : i32, i32
  }
  func.func @transform_5(%arg0: i32, %arg1: i32) -> (i32, i32) {
    %c0_i32 = arith.constant 0 : i32
    %c0_i32_0 = arith.constant 0 : i32
    return %arg0, %c0_i32 : i32, i32
  }
}

</mosaic_0001>

<bundles_post_ra>
// kernel: tpu_custom_call.1
= control target key start
LH: loop header
LB: loop body
LE: loop exit
PB: predicated region body
PF: predicated region fallthrough
CT: control target
= control target key end

     0   :  { %s1325_s0 = inlined_call_operand.hbm [shape: bf16[1,16,1024], index: 0, kind: input, shape index: {}]   ;;  %s1326_s1 = inlined_call_operand.hbm [shape: bf16[1024,128], index: 1, kind: input, shape index: {}]   ;;  %s1327_s2 = inlined_call_operand.vmem [shape: f32[1,128], index: 2, kind: input, shape index: {}]   ;;  %s1328_s3 = inlined_call_operand.hbm [shape: bf16[128,128], index: 3, kind: input, shape index: {}]   ;;  %s1329_s4 = inlined_call_operand.vmem [shape: f32[1,128], index: 4, kind: input, shape index: {}]   ;;  %s1330_s5 = inlined_call_operand.hbm [shape: f32[8,128], index: 5, kind: output, shape index: {}]  }
   0x1   :  { %1335 = sst [smem:[#allocation17_spill]] %s1325_s0 }
   0x2   :  { %1336 = sst [smem:[#allocation18_spill]] %s1328_s3 }
   0x3   :  { %10 = vsyncpa [#allocation4], 0 }
   0x4   :  { %12 = vsyncpa [#allocation4 + $0x1], 0 }
   0x5   :  { %13 = vsyncpa [#allocation7], 0 }
   0x6   :  { %15 = vsyncpa [#allocation7 + $0x1], 0 }
   0x7   :  { %16 = vsyncpa [#allocation5], 0  ;;  %s1158_s18 = smov 0   ;;  %s1160_s19 = smov 0  }
   0x8   :  { %s1162_s20 = smov 0   ;;  %s1164_s21 = smov 0  }
   0x9   :  { %s1166_s22 = smov 0   ;;  %s1168_s23 = smov 0  }
   0xa LB: > { %1337 = sst [smem:[#allocation14_spill]] %s1106_s20  ;;  %s1187_s24 = sadd.s32 4294967295, %s1118_s23   ;;  %s1118_s23 = sphi %s1168_s23, %s22_s23   ;;  %s1114_s22 = sphi %s1166_s22, %s1354_s22   ;;  %s1110_s21 = sphi %s1164_s21, %s1353_s21   ;;  %s1106_s20 = sphi %s1162_s20, %s1349_s20   ;;  %s1102_s19 = sphi %s1160_s19, %s1352_s19   ;;  %s1098_s18 = sphi %s1158_s18, %s1351_s18  }
   0xb   : > { %p56_p0 = scmp.ne.s32.totalorder %s1102_s19, %s1098_s18  ;;  %p57_p1 = scmp.eq.s32.totalorder %s1187_s24, 0 }
   0xc   : > { %p701_p2 = scmp.ge.s32.totalorder %s1118_s23, 1  ;;  %p182_p3 = scmp.lt.s32.totalorder %s1118_s23, 5 }
   0xd   : > { %p1195_p4 = por %p57_p1, %p56_p0  ;;  %s1339_s3 = sld [smem:[#allocation18_spill]] }
   0xe   : > { %p1202_p5 = pnand %p701_p2, %p182_p3  ;;  %s1120_s30 = smov [#allocation8]  }
   0xf   : > { %s198_s6 = sshll.u32 %s1120_s30, 4  ;;  %s1331_s7 = smov 64   ;;  %s199_s6 = int_to_ptr.vmem [resolvable:$true] %s198_s6 }
  0x10   : > { %p864_p6 = pneg %p1202_p5  ;;  %s1332_s8 = smov 4  }
  0x11   : > { %s31_s9 = sadd.s32 1, %s1114_s22  ;;  %s43_s10 = sadd.s32 1, %s1106_s20 }
  0x12   : > { %p865_p7 = pnand %p864_p6, %p57_p1  ;;  %p32_p8 = scmp.ge.s32.totalorder %s31_s9, 4 }
  0x13   : > { %s196_s28 = sshll.u32 %s1339_s3, 4  ;;  %p50_p9 = scmp.ne.s32.totalorder %s1106_s20, %s1102_s19  ;;  %s197_s28 = int_to_ptr.hbm [resolvable:$true] %s196_s28 }
  0x14   : > { %867 = dma.hbm_to_vmem [thread:$0]  (!%p865_p7), %s197_s28, 1024, %s199_s6, [#allocation7], %s1331_s7, %s1331_s7, %s1332_s8  }
  0x15   : > { %p51_p10 = scmp.eq.s32.totalorder %s1118_s23, 0  ;;  %s1356_s9 = smov (%p32_p8, %s31_s9), 0 }
  0x16   : > { %1341 = sst [smem:[#allocation15_spill]] %s1356_s9  ;;  %p876_p12 = scmp.lt.s32.totalorder %s1118_s23, 4 }
  0x17   : > { %p1220_p11 = por %p51_p10, %p50_p9  ;;  %s39_s12 = ssub.s32 %s1114_s22, %s1356_s9 }
  0x18   : > { %s215_s13 = sand.u32 1, %s1106_s20   ;;  %p41_p13 = scmp.eq.s32.totalorder %s39_s12, 0 }
  0x19   : > { %s704_s14 = sshll.u32 %s215_s13, 4  ;;  %s824_s15 = sshll.u32 %s1114_s22, 3 }
  0x1a   : > { %s1230_s16 = scalar_select %p41_p13, %s1106_s20, %s43_s10  }
  0x1b   : > { %s1344_s0 = sld [smem:[#allocation17_spill]]  ;;  %s219_s28 = scalar_lea.vmem [#allocation3], %s704_s14 }
  0x1c   : > { %1343 = sst [smem:[#allocation16_spill]] %s1230_s16  ;;  %s229_s30 = sshll.u32 %s219_s28, 4  ;;  %s230_s30 = int_to_ptr.vmem [resolvable:$true] %s229_s30 }
  0x1d   : > { %p1239_p0 = pnand %p876_p12, %p1220_p11  ;;  %s239_s12 = sand.u32 1, %s1118_s23  }
  0x1e   : > { %s216_s10 = scalar_lea.sflag [#allocation4], %s215_s13  ;;  %s1123_s7 = smov 512  }
  0x1f   : > { %s1124_s8 = smov 128   ;;  %s1125_s3 = smov 8  }
  0x20   : > { %s825_s14 = sshll.u32 %s1114_s22, 7  ;;  %s240_s9 = scalar_lea.sflag [#allocation7], %s239_s12 }
  0x21   : > { %s226_s26 = scalar_lea.hbm %s1344_s0, %s824_s15  ;;  %s707_s15 = sshll.u32 %s215_s13, 7 }
  0x22   : > { %s227_s27 = sshll.u32 %s226_s26, 4  ;;  %s248_s11 = scalar_lea.hbm %s1326_s1, %s825_s14  ;;  %s228_s27 = int_to_ptr.hbm [resolvable:$true] %s227_s27 }
  0x23   : > { %871 = dma.hbm_to_vmem [thread:$0]  (!%p1239_p0), %s228_s27, 256, %s230_s30, %s216_s10, %s1123_s7, %s1124_s8, %s1125_s3  }
  0x24   : > { %s243_s26 = scalar_lea.vmem [#allocation6], %s707_s15  ;;  %s249_s0 = sshll.u32 %s248_s11, 4  ;;  %s250_s0 = int_to_ptr.hbm [resolvable:$true] %s249_s0 }
  0x25   : > { %s251_s28 = sshll.u32 %s243_s26, 4  ;;  %s1346_s16 = smov 4   ;;  %s252_s28 = int_to_ptr.vmem [resolvable:$true] %s251_s28 }
  0x26   : > { %s1347_s20 = smov 64   ;;  %263 = sbr.rel (%p1202_p5) target bundleno = 403 (0x193), region = 40 }
  0x27   : > { %874 = dma.hbm_to_vmem [thread:$0]  (!%p1239_p0), %s250_s0, 2048, %s252_s28, %s240_s9, %s1347_s20, %s1347_s20, %s1346_s16  }
  0x28   : > { %s265_s3 = sand.u32 (!%p1202_p5), 1, %s1102_s19  }
  0x29   : > { %s711_s7 = sshll.u32 (!%p1202_p5), %s265_s3, 4  ;;  %s266_s8 = scalar_lea.sflag (!%p1202_p5), [#allocation4], %s265_s3 }
  0x2a   : > { %s1258_s13 = scalar_lea.vmem (!%p1202_p5), [#allocation3], %s711_s7 }
  0x2b   : > { %1081 = dma.done.wait (%p1195_p4), %s266_s8, 256  }
  0x2c   : > { %1083 = vsyncadd (%p1195_p4), %s266_s8, 4294967040  ;;  %s275_s27 = sand.u32 1, %s1187_s24   ;;  %s712_s30 = sshll.u32 %s265_s3, 7 }
  0x2d   : > { %s276_s0 = scalar_lea.sflag [#allocation7], %s275_s27  ;;  %s1265_s20 = scalar_lea.vmem [#allocation6], %s712_s30 }
  0x2e   : > { %1085 = dma.done.wait (%p1195_p4), %s276_s0, 2048  }
  0x2f   : > { %1087 = vsyncadd (%p1195_p4), %s276_s0, 4294965248 }
  0x30   : > { %1089 = dma.done.wait (%p57_p1), [#allocation7], 1024  }
  0x31   : > { %1091 = vsyncadd (%p57_p1), [#allocation7], 4294966272  ;;  %p714_p2 = scmp.ne.s32.totalorder %s1110_s21, 0 }
  0x33   : > { %317 = sbr.rel (%p714_p2) target bundleno = 59 (0x3b), region = 56 }
  0x38   : > { %v1126_v0 = vmov 0.0  }
  0x39   : > { %318 = vst [vmem:[#allocation2] sm:$0xff] %v1126_v0 }
  0x3a   : > { %319 = vst [vmem:[#allocation2 + $0x8] sm:$0xff] %v1126_v0 }
  0x3b PF: > { %v835_v1 = vld [vmem:[%s1265_s20 + $0x38] sm:$0xff]  ;;  %v834_v3 = vld [vmem:[%s1265_s20 + $0x30] sm:$0xff]  ;;  %v833_v5 = vld [vmem:[%s1265_s20 + $0x28] sm:$0xff]  ;;  %p787_p1 = scmp.ne.s32.totalorder %s1110_s21, 3 }
  0x3c   : > { %v843_v2 = vld [vmem:[%s1265_s20 + $0x78] sm:$0xff]  ;;  %462 = vmatpush.bf16.msra.mxu0 %v835_v1  ;;  %v842_v4 = vld [vmem:[%s1265_s20 + $0x70] sm:$0xff]  ;;  %v841_v6 = vld [vmem:[%s1265_s20 + $0x68] sm:$0xff] }
  0x3d   : > { %476 = vmatpush.bf16.msra.mxu1 %v843_v2  ;;  %v832_v7 = vld [vmem:[%s1265_s20 + $0x20] sm:$0xff]  ;;  %v831_v9 = vld [vmem:[%s1265_s20 + $0x18] sm:$0xff]  ;;  %v830_v11 = vld [vmem:[%s1265_s20 + $0x10] sm:$0xff] }
  0x3e   : > { %v840_v8 = vld [vmem:[%s1265_s20 + $0x60] sm:$0xff]  ;;  %v839_v10 = vld [vmem:[%s1265_s20 + $0x58] sm:$0xff]  ;;  %v838_v12 = vld [vmem:[%s1265_s20 + $0x50] sm:$0xff] }
  0x3f   : > { %v829_v13 = vld [vmem:[%s1265_s20 + $0x8] sm:$0xff]  ;;  %v828_v15 = vld [vmem:[%s1265_s20] sm:$0xff] }
  0x40   : > { %463 = vmatpush.bf16.msra.mxu0 %v834_v3  ;;  %v837_v14 = vld [vmem:[%s1265_s20 + $0x48] sm:$0xff]  ;;  %v836_v16 = vld [vmem:[%s1265_s20 + $0x40] sm:$0xff]  ;;  %v320_v24 = vld [vmem:[#allocation2] sm:$0xff] }
  0x41   : > { %477 = vmatpush.bf16.msra.mxu1 %v842_v4  ;;  %v717_v17 = vld [vmem:[%s1258_s13] sm:$0xf]  ;;  %v827_v18 = vld [vmem:[%s1258_s13 + $0x4] sm:$0xf0]  ;;  %v826_v19 = vld [vmem:[%s1258_s13 + $0x4] sm:$0xf] }
  0x42   : > { %v719_v20 = vld [vmem:[%s1258_s13 + $0x8] sm:$0xf0]  ;;  %v718_v21 = vor.u32 %v827_v18, %v717_v17 }
  0x43   : > { %v722_v22 = vor.u32 %v826_v19, %v719_v20  ;;  %v321_v29 = vld [vmem:[#allocation2 + $0x8] sm:$0xff] }
  0x44   : > { %464 = vmatpush.bf16.msra.mxu0 %v833_v5 }
  0x45   : > { %478 = vmatpush.bf16.msra.mxu1 %v841_v6 }
  0x48   : > { %465 = vmatpush.bf16.msra.mxu0 %v832_v7 }
  0x49   : > { %479 = vmatpush.bf16.msra.mxu1 %v840_v8 }
  0x4c   : > { %466 = vmatpush.bf16.msra.mxu0 %v831_v9 }
  0x4d   : > { %480 = vmatpush.bf16.msra.mxu1 %v839_v10 }
  0x50   : > { %467 = vmatpush.bf16.msra.mxu0 %v830_v11 }
  0x51   : > { %481 = vmatpush.bf16.msra.mxu1 %v838_v12 }
  0x54   : > { %468 = vmatpush.bf16.msra.mxu0 %v829_v13 }
  0x55   : > { %482 = vmatpush.bf16.msra.mxu1 %v837_v14 }
  0x58   : > { %469 = vmatpush.bf16.msra.mxu0 %v828_v15 }
  0x59   : > { %483 = vmatpush.bf16.msra.mxu1 %v836_v16 }
  0x5b   : > { %470 = vmatmul.bf16.vlgmr.msra.gmra.mxu0 %v718_v21 }
  0x5c   : > { %484 = vmatmul.bf16.vlgmr.msra.gmra.mxu1 %v722_v22 }
  0xd8   : > { %v471_v23 = vpop.f32.mrf.mxu0 }
  0xd9   : > { %v485_v25 = vpop.f32.mrf.mxu1 }
  0xda   : > { %v486_v26 = vadd.f32 %v485_v25, %v471_v23 }
  0xdc   : > { %v490_v27 = vadd.f32 %v486_v26, %v320_v24 }
  0xde   : > { %492 = vst [vmem:[#allocation2] sm:$0xff] %v490_v27 }
  0xe0   : > { %v473_v28 = vpop.f32.mrf.mxu0 }
  0xe1   : > { %v487_v30 = vpop.f32.mrf.mxu1 }
  0xe2   : > { %v488_v31 = vadd.f32 %v487_v30, %v473_v28  ;;  %497 = sbr.rel (%p787_p1) target bundleno = 397 (0x18d), region = 60 }
  0xe4   : > { %v491_v32 = vadd.f32 %v488_v31, %v321_v29 }
  0xe6   : > { %493 = vst [vmem:[#allocation2 + $0x8] sm:$0xff] %v491_v32 }
  0xe7   : > { %v851_v33 = vld [vmem:[#allocation8 + $0x38] sm:$0xff]  ;;  %v850_v34 = vld [vmem:[#allocation8 + $0x30] sm:$0xff]  ;;  %v849_v35 = vld [vmem:[#allocation8 + $0x28] sm:$0xff] }
  0xe8   : > { %579 = vmatpush.bf16.msra.mxu0 %v851_v33  ;;  %v936_v36 = vld [vmem:[%s1327_s2] ss:$0 sm:$0xff]  ;;  %v848_v37 = vld [vmem:[#allocation8 + $0x20] sm:$0xff]  ;;  %v847_v42 = vld [vmem:[#allocation8 + $0x18] sm:$0xff] }
  0xe9   : > { %v498_v38 = vld [vmem:[#allocation2] sm:$0xff]  ;;  %v845_v47 = vld [vmem:[#allocation8 + $0x8] sm:$0xff]  ;;  %v844_v49 = vld [vmem:[#allocation8] sm:$0xff] }
  0xea   : > { %v504_v40 = vadd.f32 %v936_v36, %v498_v38  ;;  %v846_v45 = vld [vmem:[#allocation8 + $0x10] sm:$0xff] }
  0xeb   : > { %v937_v51 = vld [vmem:[%s1329_s4] ss:$0 sm:$0xff] }
  0xec   : > { %580 = vmatpush.bf16.msra.mxu0 %v850_v34  ;;  %v506_v43 = vmax.f32 %v504_v40, 0.0 }
  0xed   : > { %v499_v39 = vld [vmem:[#allocation2 + $0x8] sm:$0xff] }
  0xee   : > { %v505_v41 = vadd.f32 %v936_v36, %v499_v39 }
  0xf0   : > { %581 = vmatpush.bf16.msra.mxu0 %v849_v35  ;;  %v507_v44 = vmax.f32 %v505_v41, 0.0 }
  0xf2   : > { %v508_v46 = vsub.f32 %v506_v43, %v507_v44 }
  0xf4   : > { %582 = vmatpush.bf16.msra.mxu0 %v848_v37  ;;  %v509_v48 = vand.u32 2147483647, %v508_v46 }
  0xf6   : > { %v510_v50 = vpack.c.bf16 %v509_v48, %v509_v48 }
  0xf8   : > { %583 = vmatpush.bf16.msra.mxu0 %v847_v42 }
  0xfc   : > { %584 = vmatpush.bf16.msra.mxu0 %v846_v45 }
 0x100   : > { %585 = vmatpush.bf16.msra.mxu0 %v845_v47 }
 0x104   : > { %586 = vmatpush.bf16.msra.mxu0 %v844_v49 }
 0x107   : > { %587 = vmatmul.bf16.vlgmr.msra.gmra.mxu0 %v510_v50 }
 0x184   : > { %v588_v52 = vpop.f32.mrf.mxu0 }
 0x185   : > { %v589_v53 = vadd.f32 %v937_v51, %v588_v52 }
 0x187   : > { %592 = vst [vmem:[#allocation9] sm:$0xff] %v589_v53 }
 0x18c   : > { %v590_v54 = vpop.f32.mrf.mxu0 }
 0x18d PF: > { %p878_p3 = scmp.eq.s32.totalorder %s1187_s24, 3  ;;  %s603_s12 = sshll.u32 %s1330_s5, 4  ;;  %s604_s12 = int_to_ptr.hbm [resolvable:$true] %s603_s12 }
 0x18e   : > { %s1127_s10 = smov [#allocation9]  }
 0x18f   : > { %s601_s15 = sshll.u32 %s1127_s10, 4  ;;  %s602_s15 = int_to_ptr.vmem [resolvable:$true] %s601_s15 }
 0x190   : > { %861 = dma.vmem_to_hbm [thread:$0]  (%p878_p3), %s602_s15, 128, %s604_s12, [#allocation5]  }
 0x191   : > { %1093 = dma.done.wait (%p878_p3), [#allocation5], 128  }
 0x192   : > { %1095 = vsyncadd (%p878_p3), [#allocation5], 4294967168 }
 0x193 PF: > { %s22_s23 = sadd.s32 1, %s1118_s23   ;;  %s1348_s14 = sld [smem:[#allocation14_spill]] }
 0x194   : > { %p19_p4 = scmp.ge.s32.totalorder %s22_s23, 6   ;;  %s1349_s20 = sld [smem:[#allocation16_spill]] }
 0x195   : > { %s1350_s24 = sld [smem:[#allocation15_spill]]  ;;  %s1351_s18 = smov %s1102_s19 }
 0x196   : > { %s1353_s21 = smov %s1114_s22 }
 0x197   :  { %21 = sbr.rel (!%p19_p4) target bundleno = 10 (0xa), region = 103 }
 0x199   : > { %s1352_s19 = smov %s1348_s14 }
 0x19b   : > { %s1354_s22 = smov %s1350_s24 }
 0x19c   :  { %617 = vsyncpa [#allocation4], 1 }
 0x19d   :  { %619 = vsyncpa [#allocation4 + $0x1], 1 }
 0x19e   :  { %620 = vsyncpa [#allocation7], 1 }
 0x19f   :  { %622 = vsyncpa [#allocation7 + $0x1], 1 }
 0x1a0   :  { %623 = vsyncpa [#allocation5], 1 }
 0x1a1   :  { %625 = vsyncpa [#allocation5 + $0x1], 1 }

</bundles_post_ra>
